<compile_context>
chip_gen: v6e
topology: v6e:2x2x1
jax: 0.10.0
libtpu: 0.0.40
codegen_flags: <defaults>
</compile_context>

<pallas_src>
import math

import jax
import jax.numpy as jnp
from jax.experimental import pallas as pl
from jax.experimental.pallas import tpu as pltpu

# ----------------------------- configuration -------------------------------
B            = 2        # batch
C_IN         = 4        # input image channels
H_IN = W_IN  = 14       # input spatial (pooled to 7x7 by the stand-in backbone)
IN_FEATURES  = 32       # backbone output channels (2560 for real b7; small here)
CHANNEL_SIZE = 64       # embedding size (fc1 output / ArcModule in_features)
OUT_FEATURE  = 16       # number of classes (ArcModule out_features)
FLAT_F       = IN_FEATURES * 49            # fc1 input dim (= in_features * 7 * 7)

# padded / tiled sizes (lane-dense outputs, sublane-aligned batch, K tiling)
B_PAD   = 8                                       # sublane minimum
N_PAD   = 128                                     # CHANNEL_SIZE padded to full lane width
OUT_PAD = 128                                     # OUT_FEATURE padded to full lane width
TK      = min(512, pl.cdiv(FLAT_F, 128) * 128)    # K tile (512 at real b7 scale)
K_PAD   = pl.cdiv(FLAT_F, TK) * TK
KT      = K_PAD // TK

ARC_S  = 15.0
ARC_M  = 0.5
COS_M  = math.cos(ARC_M)
SIN_M  = math.sin(ARC_M)
TH     = math.cos(math.pi - ARC_M)
MM     = math.sin(math.pi - ARC_M) * ARC_M
BN_EPS = 1e-5
L2_EPS = 1e-12


# ------------------------------ Pallas kernels ------------------------------
def head_kernel(x_ref, w1_ref, b1_ref, out_ref, acc_ref):
    """(bn1,bn2 pre-folded) fc1 matmul over K tiles -> L2 normalize.  Output is a
    lane-dense (B_PAD, 128) slab; columns >= CHANNEL_SIZE are zero."""
    k = pl.program_id(0)

    @pl.when(k == 0)
    def _():
        acc_ref[...] = jnp.zeros_like(acc_ref)

    acc_ref[...] += jnp.dot(x_ref[...], w1_ref[...],
                            preferred_element_type=jnp.float32)

    @pl.when(k == pl.num_programs(0) - 1)
    def _():
        z = acc_ref[...] + b1_ref[...]
        # F.normalize(dim=1, eps=1e-12): x / max(||x||, eps) == x * rsqrt(max(sumsq, eps^2))
        inv = jax.lax.rsqrt(jnp.maximum(jnp.sum(z * z, axis=1, keepdims=True),
                                        L2_EPS * L2_EPS))
        out_ref[...] = z * inv


def fused_head_arc_kernel(labels_ref, x_ref, w1_ref, b1_ref, wn_ref,
                          out_ref, acc_ref):
    """Fused: fc1 (folded bn1/bn2) -> L2 normalize -> ArcModule margin.
    labels_ref lives in SMEM (scalar prefetch)."""
    k = pl.program_id(0)

    @pl.when(k == 0)
    def _():
        acc_ref[...] = jnp.zeros_like(acc_ref)

    acc_ref[...] += jnp.dot(x_ref[...], w1_ref[...],
                            preferred_element_type=jnp.float32)

    @pl.when(k == pl.num_programs(0) - 1)
    def _():
        z = acc_ref[...] + b1_ref[...]
        inv = jax.lax.rsqrt(jnp.maximum(jnp.sum(z * z, axis=1, keepdims=True),
                                        L2_EPS * L2_EPS))
        feat = z * inv                                     # F.normalize(features)

        # cos_th = feat @ normalize(W).T  (weight pre-normalized & transposed at init)
        cos_th = jnp.dot(feat, wn_ref[...], preferred_element_type=jnp.float32)
        cos_th = jnp.clip(cos_th, -1.0, 1.0)
        sin_th = jnp.sqrt(1.0 - cos_th * cos_th)
        cos_th_m = cos_th * COS_M - sin_th * SIN_M
        # torch.where(cos_th > th, ...) followed by cos_th_m[cos_th <= th] = cos_th - mm
        # is the same selection applied twice -> one jnp.where.
        cos_th_m = jnp.where(cos_th > TH, cos_th_m, cos_th - MM)

        # one-hot from SMEM labels (B_PAD is small & static -> unrolled selects)
        row = jax.lax.broadcasted_iota(jnp.int32, (B_PAD, OUT_PAD), 0)
        col = jax.lax.broadcasted_iota(jnp.int32, (B_PAD, OUT_PAD), 1)
        lab = jnp.full((B_PAD, OUT_PAD), -1, jnp.int32)
        for i in range(B_PAD):
            lab = jnp.where(row == i, labels_ref[i], lab)
        onehot = (col == lab).astype(jnp.float32)

        out_ref[...] = (onehot * cos_th_m + (1.0 - onehot) * cos_th) * ARC_S


# ------------------------------- backbone -----------------------------------
def _backbone_flat(x, w_proj):
    # TODO(synk): timm efficientnet_b7 (pretrained) backbone has no faithful Pallas
    # equivalent without its checkpoint; stand-in = 2x2 avg-pool to 7x7 + 1x1 conv
    # channel projection, preserving the (B, in_features, 7, 7) shape contract.
    b, c, h, w = x.shape
    pooled = x.reshape(b, c, 7, h // 7, 7, w // 7).mean(axis=(3, 5))   # (B, C, 7, 7)
    feats = jnp.einsum("bchw,kc->bkhw", pooled, w_proj)                # (B, IN_FEATURES, 7, 7)
    # NCHW row-major flatten == torch features.view(B, -1)
    return feats.reshape(b, -1)                                        # (B, FLAT_F)


# ------------------------------ pallas wrappers ------------------------------
_COMPILER_PARAMS = pltpu.CompilerParams(
    dimension_semantics=("arbitrary",),   # K is a reduction axis (resident output)
    # TODO(synk): at real b7 scale (FLAT_F=125440) also set vmem_limit_bytes here.
)


@jax.jit
def _forward_embed(x, w_proj, w1p, b1p):
    x_flat = _backbone_flat(x, w_proj)
    b = x.shape[0]
    xp = (jnp.zeros((B_PAD, K_PAD), jnp.bfloat16)
          .at[:b, :FLAT_F].set(x_flat.astype(jnp.bfloat16)))

    out = pl.pallas_call(
        head_kernel,
        out_shape=jax.ShapeDtypeStruct((B_PAD, N_PAD), jnp.float32),
        grid_spec=pltpu.PrefetchScalarGridSpec(
            num_scalar_prefetch=0,
            grid=(KT,),
            in_specs=[pl.BlockSpec((B_PAD, TK), lambda k: (0, k)),
                      pl.BlockSpec((TK, N_PAD), lambda k: (k, 0)),
                      pl.BlockSpec((1, N_PAD), lambda k: (0, 0))],
            out_specs=pl.BlockSpec((B_PAD, N_PAD), lambda k: (0, 0)),
            scratch_shapes=[pltpu.VMEM((B_PAD, N_PAD), jnp.float32)]),
        compiler_params=_COMPILER_PARAMS,
    )(xp, w1p, b1p)
    return out[:b, :CHANNEL_SIZE]


@jax.jit
def _forward_logits(x, labels, w_proj, w1p, b1p, wnp):
    x_flat = _backbone_flat(x, w_proj)
    b = x.shape[0]
    xp = (jnp.zeros((B_PAD, K_PAD), jnp.bfloat16)
          .at[:b, :FLAT_F].set(x_flat.astype(jnp.bfloat16)))
    lab = jnp.zeros((B_PAD,), jnp.int32).at[:b].set(labels.astype(jnp.int32))

    out = pl.pallas_call(
        fused_head_arc_kernel,
        out_shape=jax.ShapeDtypeStruct((B_PAD, OUT_PAD), jnp.float32),
        grid_spec=pltpu.PrefetchScalarGridSpec(
            num_scalar_prefetch=1,                       # labels -> SMEM
            grid=(KT,),
            in_specs=[pl.BlockSpec((B_PAD, TK), lambda k, lab: (0, k)),
                      pl.BlockSpec((TK, N_PAD), lambda k, lab: (k, 0)),
                      pl.BlockSpec((1, N_PAD), lambda k, lab: (0, 0)),
                      pl.BlockSpec((N_PAD, OUT_PAD), lambda k, lab: (0, 0))],
            out_specs=pl.BlockSpec((B_PAD, OUT_PAD), lambda k, lab: (0, 0)),
            scratch_shapes=[pltpu.VMEM((B_PAD, N_PAD), jnp.float32)]),
        compiler_params=_COMPILER_PARAMS,
    )(lab, xp, w1p, b1p, wnp)
    return out[:b, :OUT_FEATURE]


# ------------------------------- params / folding ----------------------------
def init_params(key):
    ks = jax.random.split(key, 12)
    p = {}
    # stand-in backbone projection
    p["w_proj"] = jax.random.normal(ks[0], (IN_FEATURES, C_IN), jnp.float32) * 0.1
    # bn1 (BatchNorm2d(in_features)), eval-mode params
    p["bn1_gamma"] = 1.0 + 0.1 * jax.random.normal(ks[1], (IN_FEATURES,), jnp.float32)
    p["bn1_beta"]  = 0.1 * jax.random.normal(ks[2], (IN_FEATURES,), jnp.float32)
    p["bn1_mean"]  = 0.1 * jax.random.normal(ks[3], (IN_FEATURES,), jnp.float32)
    p["bn1_var"]   = 1.0 + 0.1 * jnp.abs(jax.random.normal(ks[4], (IN_FEATURES,), jnp.float32))
    # fc1: Linear(FLAT_F, CHANNEL_SIZE); torch weight is (out, in)
    p["fc1_w"] = jax.random.normal(ks[5], (CHANNEL_SIZE, FLAT_F), jnp.float32) / math.sqrt(FLAT_F)
    p["fc1_b"] = 0.01 * jax.random.normal(ks[6], (CHANNEL_SIZE,), jnp.float32)
    # bn2 (BatchNorm1d(channel_size)), eval-mode params
    p["bn2_gamma"] = 1.0 + 0.1 * jax.random.normal(ks[7], (CHANNEL_SIZE,), jnp.float32)
    p["bn2_beta"]  = 0.1 * jax.random.normal(ks[8], (CHANNEL_SIZE,), jnp.float32)
    p["bn2_mean"]  = 0.1 * jax.random.normal(ks[9], (CHANNEL_SIZE,), jnp.float32)
    p["bn2_var"]   = 1.0 + 0.1 * jnp.abs(jax.random.normal(ks[10], (CHANNEL_SIZE,), jnp.float32))
    # ArcModule weight (out_features, in_features), xavier_normal_-style init
    std = math.sqrt(2.0 / (OUT_FEATURE + CHANNEL_SIZE))
    p["arc_w"] = std * jax.random.normal(ks[11], (OUT_FEATURE, CHANNEL_SIZE), jnp.float32)
    return p


def fold_params(p):
    """One-time prep: fold bn1/bn2 into fc1, normalize+transpose the ArcFace weight,
    pad everything to lane/sublane-aligned shapes, cast matmul operands to bf16."""
    # bn1 (eval) per-channel affine, repeated over the 49 spatial positions of NCHW flatten
    s1c  = p["bn1_gamma"] / jnp.sqrt(p["bn1_var"] + BN_EPS)
    sh1c = p["bn1_beta"] - p["bn1_mean"] * s1c
    s1   = jnp.repeat(s1c, 49)                                  # (FLAT_F,)
    sh1  = jnp.repeat(sh1c, 49)
    # bn2 (eval) affine
    s2  = p["bn2_gamma"] / jnp.sqrt(p["bn2_var"] + BN_EPS)
    sh2 = p["bn2_beta"] - p["bn2_mean"] * s2

    W = p["fc1_w"]                                              # (CHANNEL_SIZE, FLAT_F)
    # y = ((x*s1 + sh1) @ W.T + b) * s2 + sh2   ==   x @ Wf + bf
    w_fold = (W * s1[None, :]).T * s2[None, :]                  # (FLAT_F, CHANNEL_SIZE)
    b_fold = (p["fc1_b"] + W @ sh1) * s2 + sh2                  # (CHANNEL_SIZE,)

    w1p = (jnp.zeros((K_PAD, N_PAD), jnp.float32)
           .at[:FLAT_F, :CHANNEL_SIZE].set(w_fold)
           .astype(jnp.bfloat16))                               # bf16 MXU operand
    b1p = jnp.zeros((1, N_PAD), jnp.float32).at[0, :CHANNEL_SIZE].set(b_fold)

    # F.normalize(arc weight, dim=1), transposed to (in, out), zero-padded
    aw  = p["arc_w"]                                            # (OUT_FEATURE, CHANNEL_SIZE)
    awn = aw * jax.lax.rsqrt(jnp.maximum(jnp.sum(aw * aw, axis=1, keepdims=True),
                                         L2_EPS * L2_EPS))
    wnp = (jnp.zeros((N_PAD, OUT_PAD), jnp.float32)
           .at[:CHANNEL_SIZE, :OUT_FEATURE].set(awn.T))

    return dict(w_proj=p["w_proj"], w1p=w1p, b1p=b1p, wnp=wnp)


def efficientnet_forward(x, folded, labels=None):
    # TODO(synk): nn.Dropout2d is identity in eval mode; train-mode RNG masking not emitted.
    if labels is None:
        return _forward_embed(x, folded["w_proj"], folded["w1p"], folded["b1p"])
    return _forward_logits(x, labels, folded["w_proj"], folded["w1p"],
                           folded["b1p"], folded["wnp"])


# ----------------------------------- main -----------------------------------
if __name__ == "__main__":
    key = jax.random.PRNGKey(0)
    k_x, k_lab, k_p = jax.random.split(key, 3)

    x = jax.random.normal(k_x, (B, C_IN, H_IN, W_IN), jnp.float32)
    labels = jax.random.randint(k_lab, (B,), 0, OUT_FEATURE, jnp.int32)

    params = init_params(k_p)
    folded = fold_params(params)          # one-time bn folding / padding / casts

    emb = efficientnet_forward(x, folded)                     # (B, CHANNEL_SIZE), L2-normalized
    logits = efficientnet_forward(x, folded, labels=labels)   # (B, OUT_FEATURE), ArcFace logits

    jax.block_until_ready(emb)
    jax.block_until_ready(logits)
    assert emb.shape == (B, CHANNEL_SIZE)
    assert logits.shape == (B, OUT_FEATURE)
    assert bool(jnp.all(jnp.isfinite(emb))) and bool(jnp.all(jnp.isfinite(logits)))
    print("KERNEL_OK")
</pallas_src>

<mosaic_0001>
module attributes {stable_mosaic.version = 11 : i64} {
  func.func @head_kernel(%arg0: i32, %arg1: memref<8x512xbf16, #tpu.memory_space<vmem>>, %arg2: memref<512x128xbf16, #tpu.memory_space<vmem>>, %arg3: memref<1x128xf32, #tpu.memory_space<vmem>>, %arg4: memref<8x128xf32, #tpu.memory_space<vmem>>, %arg5: memref<8x128xf32, #tpu.memory_space<vmem>>) attributes {dimension_semantics = [#tpu.dimension_semantics<arbitrary>], iteration_bounds = array<i64: 4>, scalar_prefetch = 0 : i64, scratch_operands = 1 : i64, tpu.core_type = #tpu.core_type<tc>, window_params = [{transform_indices = @transform_0, window_bounds = array<i64: 8, 512>}, {transform_indices = @transform_1, window_bounds = array<i64: 512, 128>}, {pipeline_mode = #tpu.pipeline_mode<synchronous>, transform_indices = @transform_2, window_bounds = array<i64: 1, 128>}, {pipeline_mode = #tpu.pipeline_mode<synchronous>, transform_indices = @transform_3, window_bounds = array<i64: 8, 128>}]} {
    %c0_i32 = arith.constant 0 : i32
    %0 = arith.cmpi eq, %arg0, %c0_i32 : i32
    %1 = arith.extui %0 : i1 to i32
    %c0_i32_0 = arith.constant 0 : i32
    %2 = arith.cmpi ne, %1, %c0_i32_0 : i32
    scf.if %2 {
      %cst_9 = arith.constant 0.000000e+00 : f32
      %12 = vector.broadcast %cst_9 : f32 to vector<8x128xf32>
      %c0_10 = arith.constant 0 : index
      %c0_11 = arith.constant 0 : index
      %13 = vector.load %arg5[%c0_10, %c0_11] : memref<8x128xf32, #tpu.memory_space<vmem>>, vector<8x128xf32>
      tpu.vector_store %arg5[%c0_10, %c0_11], %12 {strides = array<i32>} : memref<8x128xf32, #tpu.memory_space<vmem>>, vector<8x128xf32>,
    } else {
    }
    %c0 = arith.constant 0 : index
    %c0_1 = arith.constant 0 : index
    %3 = vector.load %arg5[%c0, %c0_1] : memref<8x128xf32, #tpu.memory_space<vmem>>, vector<8x128xf32>
    %c0_2 = arith.constant 0 : index
    %c0_3 = arith.constant 0 : index
    %4 = vector.load %arg1[%c0_2, %c0_3] : memref<8x512xbf16, #tpu.memory_space<vmem>>, vector<8x512xbf16>
    %c0_4 = arith.constant 0 : index
    %c0_5 = arith.constant 0 : index
    %5 = vector.load %arg2[%c0_4, %c0_5] : memref<512x128xbf16, #tpu.memory_space<vmem>>, vector<512x128xbf16>
    %cst = arith.constant dense<0.000000e+00> : vector<8x128xf32>
    %6 = tpu.matmul %4, %5, %cst {dimension_numbers = #tpu.dot_dimension_numbers<[1], [0], [0], [1], [0, 0, 1, 1], [], []>} : vector<8x512xbf16>, vector<512x128xbf16>, vector<8x128xf32> -> vector<8x128xf32>
    %7 = arith.addf %3, %6 : vector<8x128xf32>
    %c0_6 = arith.constant 0 : index
    %c0_7 = arith.constant 0 : index
    %8 = vector.load %arg5[%c0_6, %c0_7] : memref<8x128xf32, #tpu.memory_space<vmem>>, vector<8x128xf32>
    tpu.vector_store %arg5[%c0_6, %c0_7], %7 {strides = array<i32>} : memref<8x128xf32, #tpu.memory_space<vmem>>, vector<8x128xf32>,
    %c3_i32 = arith.constant 3 : i32
    %9 = arith.cmpi eq, %arg0, %c3_i32 : i32
    %10 = arith.extui %9 : i1 to i32
    %c0_i32_8 = arith.constant 0 : i32
    %11 = arith.cmpi ne, %10, %c0_i32_8 : i32
    scf.if %11 {
      %c0_9 = arith.constant 0 : index
      %c0_10 = arith.constant 0 : index
      %12 = vector.load %arg5[%c0_9, %c0_10] : memref<8x128xf32, #tpu.memory_space<vmem>>, vector<8x128xf32>
      %c0_11 = arith.constant 0 : index
      %c0_12 = arith.constant 0 : index
      %13 = vector.load %arg3[%c0_11, %c0_12] : memref<1x128xf32, #tpu.memory_space<vmem>>, vector<1x128xf32>
      %14 = vector.broadcast %13 : vector<1x128xf32> to vector<8x128xf32>
      %15 = arith.addf %12, %14 : vector<8x128xf32>
      %16 = arith.mulf %15, %15 : vector<8x128xf32>
      %cst_13 = arith.constant dense<0.000000e+00> : vector<8xf32>
      %17 = vector.multi_reduction <add>, %16, %cst_13 [1] : vector<8x128xf32> to vector<8xf32>
      %18 = vector.shape_cast %17 : vector<8xf32> to vector<8x1xf32>
      %cst_14 = arith.constant 1.000000e-24 : f32
      %19 = vector.broadcast %cst_14 : f32 to vector<8x1xf32>
      %20 = arith.maximumf %18, %19 : vector<8x1xf32>
      %21 = math.rsqrt %20 : vector<8x1xf32>
      %22 = vector.broadcast %21 : vector<8x1xf32> to vector<8x128xf32>
      %23 = arith.mulf %15, %22 : vector<8x128xf32>
      %c0_15 = arith.constant 0 : index
      %c0_16 = arith.constant 0 : index
      %24 = vector.load %arg4[%c0_15, %c0_16] : memref<8x128xf32, #tpu.memory_space<vmem>>, vector<8x128xf32>
      tpu.vector_store %arg4[%c0_15, %c0_16], %23 {strides = array<i32>} : memref<8x128xf32, #tpu.memory_space<vmem>>, vector<8x128xf32>,
    } else {
    }
    return
  }
  func.func @transform_0(%arg0: i32) -> (i32, i32) {
    %c0_i32 = arith.constant 0 : i32
    %c0_i32_0 = arith.constant 0 : i32
    return %c0_i32, %arg0 : i32, i32
  }
  func.func @transform_1(%arg0: i32) -> (i32, i32) {
    %c0_i32 = arith.constant 0 : i32
    %c0_i32_0 = arith.constant 0 : i32
    return %arg0, %c0_i32 : i32, i32
  }
  func.func @transform_2(%arg0: i32) -> (i32, i32) {
    %c0_i32 = arith.constant 0 : i32
    %c0_i32_0 = arith.constant 0 : i32
    %c0_i32_1 = arith.constant 0 : i32
    return %c0_i32, %c0_i32_0 : i32, i32
  }
  func.func @transform_3(%arg0: i32) -> (i32, i32) {
    %c0_i32 = arith.constant 0 : i32
    %c0_i32_0 = arith.constant 0 : i32
    %c0_i32_1 = arith.constant 0 : i32
    return %c0_i32, %c0_i32_0 : i32, i32
  }
}

</mosaic_0001>

<bundles_post_ra>
// kernel: _forward_embed.1
= control target key start
LH: loop header
LB: loop body
LE: loop exit
PB: predicated region body
PF: predicated region fallthrough
CT: control target
= control target key end

     0   :  { %s770_s12 = smov 0   ;;  %s837_s0 = inlined_call_operand.vmem [shape: bf16[8,2048], index: 0, kind: input, shape index: {}]   ;;  %s838_s1 = inlined_call_operand.vmem [shape: bf16[2048,128], index: 1, kind: input, shape index: {}]   ;;  %s839_s2 = inlined_call_operand.vmem [shape: f32[1,128], index: 2, kind: input, shape index: {}]   ;;  %s840_s3 = inlined_call_operand.vmem [shape: f32[8,128], index: 3, kind: output, shape index: {}]  }
   0x1 LB: > { %s776_s13 = sadd.s32 4294967295, %s747_s12   ;;  %p604_p0 = scmp.ge.s32.totalorder %s747_s12, 1  ;;  %s747_s12 = sphi %s770_s12, %s13_s12  }
   0x2   : > { %p144_p1 = scmp.lt.s32.totalorder %s747_s12, 5 }
   0x4   : > { %p145_p2 = pnand %p604_p0, %p144_p1 }
   0x5   : > { %s605_s14 = sshll.u32 (!%p145_p2), %s776_s13, 2  ;;  %s607_s15 = sshll.u32 (!%p145_p2), %s776_s13, 6 }
   0x6   : > { %148 = sbr.rel (%p145_p2) target bundleno = 426 (0x1aa), region = 32  ;;  %p169_p3 = scmp.lt.s32.totalorder (!%p145_p2), %s605_s14, 15 }
   0x7   : > { %p175_p4 = scmp.lt.s32.totalorder (!%p145_p2), %s607_s15, 255  ;;  %p609_p5 = scmp.ne.s32.totalorder (!%p145_p2), %s776_s13, 0 }
   0xb   : > { %s842_s14 = smov (!%p169_p3, %s605_s14), 15  ;;  %s844_s15 = smov (!%p175_p4, %s607_s15), 255 }
   0xc   : > { %s606_s16 = sshll.u32 %s842_s14, 2  ;;  %s608_s20 = sshll.u32 %s844_s15, 2 }
   0xd   : > { %s785_s19 = scalar_lea.vmem %s837_s0, %s606_s16  ;;  %s790_s23 = scalar_lea.vmem %s838_s1, %s608_s20 }
   0xe   : > { %184 = sbr.rel (%p609_p5) target bundleno = 21 (0x15), region = 36 }
  0x13   : > { %v749_v0 = vmov 0.0  }
  0x14   : > { %185 = vst [vmem:[#allocation2] sm:$0xff] %v749_v0 }
  0x15 PF: > { %v703_v1 = vld [vmem:[%s790_s23 + $0x78] sm:$0xff]   ;;  %v707_v5 = vld [vmem:[%s790_s23 + $0x70] sm:$0xff]   ;;  %v711_v9 = vld [vmem:[%s790_s23 + $0x68] sm:$0xff]   ;;  %p646_p6 = scmp.ne.s32.totalorder %s776_s13, 3 }
  0x16   : > { %v704_v2 = vld [vmem:[%s790_s23 + $0xf8] sm:$0xff]   ;;  %650 = vmatprep.subr.bf16.mxu0 %v703_v1  ;;  %v708_v6 = vld [vmem:[%s790_s23 + $0xf0] sm:$0xff]   ;;  %v712_v10 = vld [vmem:[%s790_s23 + $0xe8] sm:$0xff]  }
  0x17   : > { %v705_v3 = vld [vmem:[%s790_s23 + $0x38] sm:$0xff]   ;;  %672 = vmatprep.subr.bf16.mxu1 %v704_v2  ;;  %v709_v7 = vld [vmem:[%s790_s23 + $0x30] sm:$0xff]   ;;  %v713_v11 = vld [vmem:[%s790_s23 + $0x28] sm:$0xff]  }
  0x18   : > { %v706_v4 = vld [vmem:[%s790_s23 + $0xb8] sm:$0xff]   ;;  %651 = vmatpush3.bf16.msra.mxu0 %v705_v3  ;;  %v710_v8 = vld [vmem:[%s790_s23 + $0xb0] sm:$0xff]   ;;  %v714_v12 = vld [vmem:[%s790_s23 + $0xa8] sm:$0xff]  }
  0x19   : > { %673 = vmatpush3.bf16.msra.mxu1 %v706_v4  ;;  %652 = vmatprep.subr.bf16.mxu0 %v707_v5  ;;  %v715_v13 = vld [vmem:[%s790_s23 + $0x60] sm:$0xff]   ;;  %v719_v17 = vld [vmem:[%s790_s23 + $0x58] sm:$0xff]   ;;  %v723_v21 = vld [vmem:[%s790_s23 + $0x50] sm:$0xff]  }
  0x1a   : > { %674 = vmatprep.subr.bf16.mxu1 %v708_v6  ;;  %v716_v14 = vld [vmem:[%s790_s23 + $0xe0] sm:$0xff]   ;;  %v720_v18 = vld [vmem:[%s790_s23 + $0xd8] sm:$0xff]   ;;  %v724_v22 = vld [vmem:[%s790_s23 + $0xd0] sm:$0xff]  }
  0x1b   : > { %v717_v15 = vld [vmem:[%s790_s23 + $0x20] sm:$0xff]   ;;  %v721_v19 = vld [vmem:[%s790_s23 + $0x18] sm:$0xff]   ;;  %v725_v23 = vld [vmem:[%s790_s23 + $0x10] sm:$0xff]  }
  0x1c   : > { %653 = vmatpush3.bf16.msra.mxu0 %v709_v7  ;;  %v718_v16 = vld [vmem:[%s790_s23 + $0xa0] sm:$0xff]   ;;  %v722_v20 = vld [vmem:[%s790_s23 + $0x98] sm:$0xff]   ;;  %v726_v24 = vld [vmem:[%s790_s23 + $0x90] sm:$0xff]  }
  0x1d   : > { %675 = vmatpush3.bf16.msra.mxu1 %v710_v8  ;;  %654 = vmatprep.subr.bf16.mxu0 %v711_v9  ;;  %v727_v25 = vld [vmem:[%s790_s23 + $0x48] sm:$0xff]   ;;  %v731_v29 = vld [vmem:[%s790_s23 + $0x40] sm:$0xff]  }
  0x1e   : > { %676 = vmatprep.subr.bf16.mxu1 %v712_v10  ;;  %v728_v26 = vld [vmem:[%s790_s23 + $0xc8] sm:$0xff]   ;;  %v732_v30 = vld [vmem:[%s790_s23 + $0xc0] sm:$0xff]  }
  0x1f   : > { %v729_v27 = vld [vmem:[%s790_s23 + $0x8] sm:$0xff]   ;;  %v733_v31 = vld [vmem:[%s790_s23] sm:$0xff]  }
  0x20   : > { %655 = vmatpush3.bf16.msra.mxu0 %v713_v11  ;;  %v730_v28 = vld [vmem:[%s790_s23 + $0x88] sm:$0xff]   ;;  %v734_v32 = vld [vmem:[%s790_s23 + $0x80] sm:$0xff]  }
  0x21   : > { %677 = vmatpush3.bf16.msra.mxu1 %v714_v12  ;;  %656 = vmatprep.subr.bf16.mxu0 %v715_v13  ;;  %v187_v33 = vld [vmem:[%s785_s19] sm:$0xff]  ;;  %v188_v34 = vld [vmem:[%s785_s19 + $0x8] sm:$0xff] }
  0x22   : > { %678 = vmatprep.subr.bf16.mxu1 %v716_v14  ;;  %v610_v35 = vcombine.low %v187_v33, %v187_v33  ;;  %v611_v36 = vcombine.high %v187_v33, %v187_v33  ;;  %v612_v37 = vcombine.low %v188_v34, %v188_v34  ;;  %v613_v38 = vcombine.high %v188_v34, %v188_v34  ;;  %v186_v45 = vld [vmem:[#allocation2] sm:$0xff] }
  0x24   : > { %657 = vmatpush3.bf16.msra.mxu0 %v717_v15  ;;  %491 = vmatprep.mubr.bf16.mxu0 %v611_v36 }
  0x25   : > { %679 = vmatpush3.bf16.msra.mxu1 %v718_v16  ;;  %658 = vmatprep.subr.bf16.mxu0 %v719_v17 }
  0x26   : > { %680 = vmatprep.subr.bf16.mxu1 %v720_v18  ;;  %531 = vmatprep.mubr.bf16.mxu1 %v613_v38 }
  0x28   : > { %659 = vmatpush3.bf16.msra.mxu0 %v721_v19 }
  0x29   : > { %681 = vmatpush3.bf16.msra.mxu1 %v722_v20  ;;  %660 = vmatprep.subr.bf16.mxu0 %v723_v21 }
  0x2a   : > { %682 = vmatprep.subr.bf16.mxu1 %v724_v22 }
  0x2c   : > { %661 = vmatpush3.bf16.msra.mxu0 %v725_v23 }
  0x2d   : > { %683 = vmatpush3.bf16.msra.mxu1 %v726_v24  ;;  %662 = vmatprep.subr.bf16.mxu0 %v727_v25 }
  0x2e   : > { %684 = vmatprep.subr.bf16.mxu1 %v728_v26 }
  0x30   : > { %663 = vmatpush3.bf16.msra.mxu0 %v729_v27 }
  0x31   : > { %685 = vmatpush3.bf16.msra.mxu1 %v730_v28  ;;  %664 = vmatprep.subr.bf16.mxu0 %v731_v29 }
  0x32   : > { %686 = vmatprep.subr.bf16.mxu1 %v732_v30 }
  0x34   : > { %665 = vmatpush3.bf16.msra.mxu0 %v733_v31 }
  0x35   : > { %687 = vmatpush3.bf16.msra.mxu1 %v734_v32 }
  0x37   : > { %492 = vmatmul.mubr.bf16.vlgmr.msra.gmra.mxu0 %v610_v35 }
  0x38   : > { %532 = vmatmul.mubr.bf16.vlgmr.msra.gmra.mxu1 %v612_v37 }
  0xf7   : > { %v666_v39 = vpop.f32.mrf.mxu0 }
  0xf8   : > { %v688_v40 = vpop.f32.mrf.mxu1 }
  0xf9   : > { %v667_v41 = vpop.f32.mrf.mxu0 }
  0xfa   : > { %v689_v42 = vpop.f32.mrf.mxu1  ;;  %v668_v43 = vadd.f32 %v667_v41, %v666_v39 }
  0xfb   : > { %v690_v44 = vadd.f32 %v689_v42, %v688_v40  ;;  %v669_v46 = vpop.f32.mrf.mxu0 }
  0xfc   : > { %v691_v47 = vpop.f32.mrf.mxu1 }
  0xfd   : > { %v534_v48 = vadd.f32 %v690_v44, %v668_v43  ;;  %v670_v49 = vpop.f32.mrf.mxu0  ;;  %544 = sbr.rel (%p646_p6) target bundleno = 426 (0x1aa), region = 40 }
  0xfe   : > { %v692_v50 = vpop.f32.mrf.mxu1 }
  0xff   : > { %v539_v51 = vadd.f32 %v534_v48, %v186_v45 }
 0x101   : > { %540 = vst [vmem:[#allocation2] sm:$0xff] %v539_v51 }
 0x102   : > { %v647_v53 = vld [vmem:[%s839_s2] ss:$0 sm:$0xff] }
 0x108   : > { %v545_v52 = vld [vmem:[#allocation2] sm:$0xff] }
 0x109   : > { %v553_v54 = vadd.f32 %v647_v53, %v545_v52 }
 0x10b   : > { %v554_v55 = vmul.f32 %v553_v54, %v553_v54 }
 0x10d   : > { %555 = vadd.xlane.f32.xlu0 %v554_v55 }
 0x196   : > { %v556_v56 = vpop.xlane.xlu0 %555 }
 0x197   : > { %v557_v57 = vmax.f32 %v556_v56, 1e-24 }
 0x199   : > { %739 = vrsqrt.f32 %v557_v57 }
 0x1a6   : > { %v740_v58 = vpop.eup %739 }
 0x1a7   : > { %v559_v59 = vmul.f32 %v740_v58, %v553_v54 }
 0x1a9   : > { %560 = vst [vmem:[%s840_s3] sm:$0xff] %v559_v59 }
 0x1aa PF: > { %s13_s12 = sadd.s32 1, %s747_s12  }
 0x1ab   : > { %p10_p7 = scmp.ge.s32.totalorder %s13_s12, 6  }
 0x1ad   :  { %12 = sbr.rel (!%p10_p7) target bundleno = 1 (0x1), region = 69 }

</bundles_post_ra>
